<compile_context>
chip_gen: v7x
topology: tpu7x:2x2x1
jax: 0.10.0
libtpu: 0.0.40
codegen_flags: <defaults>
</compile_context>

<pallas_src>
import functools

import jax
import jax.numpy as jnp
from jax.experimental import pallas as pl
from jax.experimental.pallas import tpu as pltpu


def _round_up(n, m):
    return ((n + m - 1) // m) * m


def mlp_kernel(x_ref, w1_ref, b1_ref, w2_ref, b2_ref, w3_ref, b3_ref, o_ref):
    # Feature-major: x_ref [in_feat, tb], wN_ref [out, in], bN_ref [out, 1],
    # o_ref [num_classes, tb].  Accumulate in f32 on the MXU; bias + ReLU in f32 on
    # the VPU; biases broadcast along the lane (batch) axis.
    x = x_ref[...]
    h1 = jnp.dot(w1_ref[...], x, preferred_element_type=jnp.float32) + b1_ref[...]
    h1 = jnp.maximum(h1, 0.0)

    h2 = jnp.dot(w2_ref[...], h1.astype(w2_ref.dtype),
                 preferred_element_type=jnp.float32) + b2_ref[...]
    h2 = jnp.maximum(h2, 0.0)

    out = jnp.dot(w3_ref[...], h2.astype(w3_ref.dtype),
                  preferred_element_type=jnp.float32) + b3_ref[...]
    o_ref[...] = out.astype(o_ref.dtype)


@functools.partial(jax.jit, static_argnames=("tile_batch",))
def mlp_forward(x, params, *, tile_batch=2048):
    """Forward pass. x: [B, input_size] (f32 or bf16). Returns [B, num_classes] f32."""
    w1, b1, w2, b2, w3, b3 = params
    batch, in_feat = x.shape
    num_classes = w3.shape[0]

    # Feature-major: put batch on the lane axis.  (Layout plumbing only; in a real
    # pipeline keep activations stored feature-major and drop this transpose.)
    xt = x.T  # [in_feat, batch]

    if batch <= tile_batch:
        tb = batch                       # single tile; block last dim == full array dim
    else:
        tb = _round_up(tile_batch, 128)  # lane-aligned tile; last tile may be partial
    grid = (pl.cdiv(batch, tb),)

    const_block = lambda i: (0, 0)       # weights/biases: VMEM-resident across steps
    in_specs = [
        pl.BlockSpec((in_feat, tb), lambda i: (0, i)),  # x^T: tiled over batch lanes
        pl.BlockSpec(w1.shape, const_block),
        pl.BlockSpec(b1.shape, const_block),
        pl.BlockSpec(w2.shape, const_block),
        pl.BlockSpec(b2.shape, const_block),
        pl.BlockSpec(w3.shape, const_block),
        pl.BlockSpec(b3.shape, const_block),
    ]
    out_specs = pl.BlockSpec((num_classes, tb), lambda i: (0, i))

    out_t = pl.pallas_call(
        mlp_kernel,
        out_shape=jax.ShapeDtypeStruct((num_classes, batch), jnp.float32),
        grid=grid,
        in_specs=in_specs,
        out_specs=out_specs,
        compiler_params=pltpu.CompilerParams(
            dimension_semantics=("parallel",),  # batch tiles are independent
        ),
    )(xt, w1, b1, w2, b2, w3, b3)
    return out_t.T  # back to [batch, num_classes]


def init_params(key, input_size, num_classes, compute_dtype=jnp.float32):
    """nn.Linear-style init: uniform(-1/sqrt(fan_in), 1/sqrt(fan_in)).

    Weights are stored [out_features, in_features] (PyTorch layout), biases as
    [out_features, 1] columns.  Weights (and x) may be bf16 to halve HBM read
    traffic on v6e/v7x; biases stay f32 so bias add + ReLU stay f32.
    """
    dims = [(input_size, 50), (50, 20), (20, num_classes)]
    params = []
    for fan_in, fan_out in dims:
        kw, kb, key = jax.random.split(key, 3)
        bound = 1.0 / jnp.sqrt(float(fan_in))
        w = jax.random.uniform(kw, (fan_out, fan_in), jnp.float32, -bound, bound)
        b = jax.random.uniform(kb, (fan_out, 1), jnp.float32, -bound, bound)
        params += [w.astype(compute_dtype), b]
    return tuple(params)


def mlp_reference(x, params):
    """Pure-JAX reference matching PyTorch semantics: relu(x W1^T + b1) ... W3^T + b3."""
    w1, b1, w2, b2, w3, b3 = params
    h = jnp.maximum(x @ w1.astype(jnp.float32).T + b1[:, 0], 0.0)
    h = jnp.maximum(h @ w2.astype(jnp.float32).T + b2[:, 0], 0.0)
    return h @ w3.astype(jnp.float32).T + b3[:, 0]


if __name__ == "__main__":
    input_size = 4   # iris features
    num_classes = 3  # iris classes

    key = jax.random.PRNGKey(0)
    kx1, kx2, kp = jax.random.split(key, 3)
    params = init_params(kp, input_size, num_classes, compute_dtype=jnp.float32)

    # Case 1: small batch -> single tile (tb == batch; block spans the full lane
    # extent, so a non-multiple-of-128 batch is fine).
    x_small = jax.random.normal(kx1, (24, input_size), jnp.float32)
    out_small = mlp_forward(x_small, params)
    jax.block_until_ready(out_small)
    assert out_small.shape == (24, num_classes)
    assert jnp.allclose(out_small, mlp_reference(x_small, params), atol=1e-5, rtol=1e-5)

    # Case 2: batch > tile -> 1-D grid over lane-aligned 128-wide batch tiles with a
    # partial final tile (exercises tiling + masked final writeback).  For real
    # workloads leave tile_batch at its 2048 default (or sweep 2048-8192).
    x_big = jax.random.normal(kx2, (200, input_size), jnp.float32)
    out_big = mlp_forward(x_big, params, tile_batch=128)
    jax.block_until_ready(out_big)
    assert out_big.shape == (200, num_classes)
    assert jnp.allclose(out_big, mlp_reference(x_big, params), atol=1e-5, rtol=1e-5)

    print("KERNEL_OK")
</pallas_src>

<mosaic_0001>
module attributes {stable_mosaic.version = 11 : i64} {
  func.func @mlp_kernel(%arg0: i32, %arg1: memref<4x24xf32, #tpu.memory_space<vmem>>, %arg2: memref<50x4xf32, #tpu.memory_space<vmem>>, %arg3: memref<50x1xf32, #tpu.memory_space<vmem>>, %arg4: memref<20x50xf32, #tpu.memory_space<vmem>>, %arg5: memref<20x1xf32, #tpu.memory_space<vmem>>, %arg6: memref<3x20xf32, #tpu.memory_space<vmem>>, %arg7: memref<3x1xf32, #tpu.memory_space<vmem>>, %arg8: memref<3x24xf32, #tpu.memory_space<vmem>>) attributes {dimension_semantics = [#tpu.dimension_semantics<parallel>], iteration_bounds = array<i64: 1>, scalar_prefetch = 0 : i64, scratch_operands = 0 : i64, tpu.core_type = #tpu.core_type<tc>, window_params = [{transform_indices = @transform_0, window_bounds = array<i64: 4, 24>}, {pipeline_mode = #tpu.pipeline_mode<synchronous>, transform_indices = @transform_1, window_bounds = array<i64: 50, 4>}, {pipeline_mode = #tpu.pipeline_mode<synchronous>, transform_indices = @transform_2, window_bounds = array<i64: 50, 1>}, {pipeline_mode = #tpu.pipeline_mode<synchronous>, transform_indices = @transform_3, window_bounds = array<i64: 20, 50>}, {pipeline_mode = #tpu.pipeline_mode<synchronous>, transform_indices = @transform_4, window_bounds = array<i64: 20, 1>}, {pipeline_mode = #tpu.pipeline_mode<synchronous>, transform_indices = @transform_5, window_bounds = array<i64: 3, 20>}, {pipeline_mode = #tpu.pipeline_mode<synchronous>, transform_indices = @transform_6, window_bounds = array<i64: 3, 1>}, {transform_indices = @transform_7, window_bounds = array<i64: 3, 24>}]} {
    %c0 = arith.constant 0 : index
    %c0_0 = arith.constant 0 : index
    %0 = vector.load %arg1[%c0, %c0_0] : memref<4x24xf32, #tpu.memory_space<vmem>>, vector<4x24xf32>
    %c0_1 = arith.constant 0 : index
    %c0_2 = arith.constant 0 : index
    %1 = vector.load %arg2[%c0_1, %c0_2] : memref<50x4xf32, #tpu.memory_space<vmem>>, vector<50x4xf32>
    %cst = arith.constant dense<0.000000e+00> : vector<50x24xf32>
    %2 = tpu.matmul %1, %0, %cst {dimension_numbers = #tpu.dot_dimension_numbers<[1], [0], [0], [1], [0, 0, 1, 1], [], []>} : vector<50x4xf32>, vector<4x24xf32>, vector<50x24xf32> -> vector<50x24xf32>
    %c0_3 = arith.constant 0 : index
    %c0_4 = arith.constant 0 : index
    %3 = vector.load %arg3[%c0_3, %c0_4] : memref<50x1xf32, #tpu.memory_space<vmem>>, vector<50x1xf32>
    %4 = vector.broadcast %3 : vector<50x1xf32> to vector<50x24xf32>
    %5 = arith.addf %2, %4 : vector<50x24xf32>
    %cst_5 = arith.constant 0.000000e+00 : f32
    %6 = vector.broadcast %cst_5 : f32 to vector<50x24xf32>
    %7 = arith.maximumf %5, %6 : vector<50x24xf32>
    %c0_6 = arith.constant 0 : index
    %c0_7 = arith.constant 0 : index
    %8 = vector.load %arg4[%c0_6, %c0_7] : memref<20x50xf32, #tpu.memory_space<vmem>>, vector<20x50xf32>
    %cst_8 = arith.constant dense<0.000000e+00> : vector<20x24xf32>
    %9 = tpu.matmul %8, %7, %cst_8 {dimension_numbers = #tpu.dot_dimension_numbers<[1], [0], [0], [1], [0, 0, 1, 1], [], []>} : vector<20x50xf32>, vector<50x24xf32>, vector<20x24xf32> -> vector<20x24xf32>
    %c0_9 = arith.constant 0 : index
    %c0_10 = arith.constant 0 : index
    %10 = vector.load %arg5[%c0_9, %c0_10] : memref<20x1xf32, #tpu.memory_space<vmem>>, vector<20x1xf32>
    %11 = vector.broadcast %10 : vector<20x1xf32> to vector<20x24xf32>
    %12 = arith.addf %9, %11 : vector<20x24xf32>
    %cst_11 = arith.constant 0.000000e+00 : f32
    %13 = vector.broadcast %cst_11 : f32 to vector<20x24xf32>
    %14 = arith.maximumf %12, %13 : vector<20x24xf32>
    %c0_12 = arith.constant 0 : index
    %c0_13 = arith.constant 0 : index
    %15 = vector.load %arg6[%c0_12, %c0_13] : memref<3x20xf32, #tpu.memory_space<vmem>>, vector<3x20xf32>
    %cst_14 = arith.constant dense<0.000000e+00> : vector<3x24xf32>
    %16 = tpu.matmul %15, %14, %cst_14 {dimension_numbers = #tpu.dot_dimension_numbers<[1], [0], [0], [1], [0, 0, 1, 1], [], []>} : vector<3x20xf32>, vector<20x24xf32>, vector<3x24xf32> -> vector<3x24xf32>
    %c0_15 = arith.constant 0 : index
    %c0_16 = arith.constant 0 : index
    %17 = vector.load %arg7[%c0_15, %c0_16] : memref<3x1xf32, #tpu.memory_space<vmem>>, vector<3x1xf32>
    %18 = vector.broadcast %17 : vector<3x1xf32> to vector<3x24xf32>
    %19 = arith.addf %16, %18 : vector<3x24xf32>
    %c0_17 = arith.constant 0 : index
    %c0_18 = arith.constant 0 : index
    %20 = vector.load %arg8[%c0_17, %c0_18] : memref<3x24xf32, #tpu.memory_space<vmem>>, vector<3x24xf32>
    tpu.vector_store %arg8[%c0_17, %c0_18], %19 {strides = array<i32>} : memref<3x24xf32, #tpu.memory_space<vmem>>, vector<3x24xf32>,
    return
  }
  func.func @transform_0(%arg0: i32) -> (i32, i32) {
    %c0_i32 = arith.constant 0 : i32
    %c0_i32_0 = arith.constant 0 : i32
    return %c0_i32, %arg0 : i32, i32
  }
  func.func @transform_1(%arg0: i32) -> (i32, i32) {
    %c0_i32 = arith.constant 0 : i32
    %c0_i32_0 = arith.constant 0 : i32
    %c0_i32_1 = arith.constant 0 : i32
    return %c0_i32, %c0_i32_0 : i32, i32
  }
  func.func @transform_2(%arg0: i32) -> (i32, i32) {
    %c0_i32 = arith.constant 0 : i32
    %c0_i32_0 = arith.constant 0 : i32
    %c0_i32_1 = arith.constant 0 : i32
    return %c0_i32, %c0_i32_0 : i32, i32
  }
  func.func @transform_3(%arg0: i32) -> (i32, i32) {
    %c0_i32 = arith.constant 0 : i32
    %c0_i32_0 = arith.constant 0 : i32
    %c0_i32_1 = arith.constant 0 : i32
    return %c0_i32, %c0_i32_0 : i32, i32
  }
  func.func @transform_4(%arg0: i32) -> (i32, i32) {
    %c0_i32 = arith.constant 0 : i32
    %c0_i32_0 = arith.constant 0 : i32
    %c0_i32_1 = arith.constant 0 : i32
    return %c0_i32, %c0_i32_0 : i32, i32
  }
  func.func @transform_5(%arg0: i32) -> (i32, i32) {
    %c0_i32 = arith.constant 0 : i32
    %c0_i32_0 = arith.constant 0 : i32
    %c0_i32_1 = arith.constant 0 : i32
    return %c0_i32, %c0_i32_0 : i32, i32
  }
  func.func @transform_6(%arg0: i32) -> (i32, i32) {
    %c0_i32 = arith.constant 0 : i32
    %c0_i32_0 = arith.constant 0 : i32
    %c0_i32_1 = arith.constant 0 : i32
    return %c0_i32, %c0_i32_0 : i32, i32
  }
  func.func @transform_7(%arg0: i32) -> (i32, i32) {
    %c0_i32 = arith.constant 0 : i32
    %c0_i32_0 = arith.constant 0 : i32
    return %c0_i32, %arg0 : i32, i32
  }
}

</mosaic_0001>

<bundles_post_ra>
// kernel: mlp_forward.1
= control target key start
LH: loop header
LB: loop body
LE: loop exit
PB: predicated region body
PF: predicated region fallthrough
CT: control target
= control target key end

     0   :  { %vm99_vm0 = vcmask 1043456   ;;  %v562_v2 = vmov 0.0   ;;  %vm563_vm1 = vmmov 0   ;;  %vm77_vm2 = vcmask 31744   ;;  %s722_s0 = inlined_call_operand.vmem [shape: f32[4,24], index: 0, kind: input, shape index: {}]   ;;  %s723_s1 = inlined_call_operand.vmem [shape: f32[50,4], index: 1, kind: input, shape index: {}]   ;;  %s724_s2 = inlined_call_operand.vmem [shape: f32[50,1], index: 2, kind: input, shape index: {}]   ;;  %s725_s3 = inlined_call_operand.vmem [shape: f32[20,50], index: 3, kind: input, shape index: {}]   ;;  %s726_s4 = inlined_call_operand.vmem [shape: f32[20,1], index: 4, kind: input, shape index: {}]   ;;  %s727_s5 = inlined_call_operand.vmem [shape: f32[3,20], index: 5, kind: input, shape index: {}]   ;;  %s728_s6 = inlined_call_operand.vmem [shape: f32[3,1], index: 6, kind: input, shape index: {}]   ;;  %s729_s7 = inlined_call_operand.hbm [shape: f32[3,24], index: 7, kind: output, shape index: {}]  }
   0x1   :  { %v27_v0 = vld [vmem:[%s722_s0] sm:$0xf]  ;;  %464 = vmatprep.subr.mxu0 %v562_v2  ;;  %466 = vmatprep.mubr.msk.f32.mxu0 %vm563_vm1, %v562_v2  ;;  %v564_v3 = vmov 0   ;;  %v37_v5 = vld [vmem:[%s724_s2 + $0x10] sm:$0xff]  ;;  %v29_v6 = vld [vmem:[%s723_s1 + $0x8] sm:$0xff] }
   0x2   :  { %v28_v1 = vld [vmem:[%s723_s1] sm:$0xff]  ;;  %465 = vmatpush3.msk.msra.mxu0 %vm99_vm0, %v27_v0  ;;  %536 = vset.pattern.permute.xlu0 %v564_v3  ;;  %v36_v7 = vld [vmem:[%s724_s2 + $0x8] sm:$0xff]  ;;  %v38_v8 = vld [vmem:[%s724_s2 + $0x18] sm:$0xff] }
   0x3   :  { %467 = vmatmul.mubr.msk.f32.vlgmr.msra.gmra.mrb[0].mxu0 %vm77_vm2, %v28_v1  ;;  %v35_v4 = vld [vmem:[%s724_s2] sm:$0xff]  ;;  %537 = vset.pattern.permute.xlu1 %v564_v3 }
   0x4   :  { %469 = vmatprep.mubr.msk.f32.mxu0 %vm563_vm1, %v562_v2  ;;  %44 = vperm.xlu0 %536, %v35_v4  }
   0x5   :  { %54 = vperm.xlu1 %537, %v37_v5   ;;  %501 = vmatprep.mubr.msk.f32.mxu1 %vm563_vm1, %v562_v2 }
   0x6   :  { %12 = vsyncpa [#allocation3], 0  ;;  %v30_v9 = vld [vmem:[%s723_s1 + $0x10] sm:$0xff]  ;;  %v39_v10 = vld [vmem:[%s724_s2 + $0x20] sm:$0xff]  ;;  %v565_v21 = vmov 0.0|0.0   ;;  %vm241_vm3 = vcmask 1041408  }
   0x7   :  { %470 = vmatmul.mubr.msk.f32.gmra.mrb[2].mxu0 %vm77_vm2, %v29_v6  ;;  %v40_v11 = vld [vmem:[%s724_s2 + $0x28] sm:$0xff]  ;;  %v31_v12 = vld [vmem:[%s723_s1 + $0x18] sm:$0xff]  ;;  %v41_v13 = vld [vmem:[%s724_s2 + $0x30] sm:$0x3]  ;;  %519 = vmatprep.subr.bf16.mxu1 %v565_v21  ;;  %vm231_vm4 = vcmask 408576   ;;  %vm335_vm5 = vcmask 162816  }
   0x8   :  { %472 = vmatprep.mubr.msk.f32.mxu0 %vm563_vm1, %v562_v2  ;;  %49 = vperm.xlu0 %536, %v36_v7   ;;  %v213_v14 = vld [vmem:[%s726_s4] sm:$0xff]  ;;  %v214_v16 = vld [vmem:[%s726_s4 + $0x8] sm:$0xff]  ;;  %v215_v17 = vld [vmem:[%s726_s4 + $0x10] sm:$0xf]  ;;  %s566_s17 = smov [#allocation2]   ;;  %vm412_vm6 = vcmask 190464  }
   0x9   :  { %59 = vperm.xlu1 %537, %v38_v8   ;;  %v32_v15 = vld [vmem:[%s723_s1 + $0x20] sm:$0xff]  ;;  %v33_v18 = vld [vmem:[%s723_s1 + $0x28] sm:$0xff]  ;;  %v34_v20 = vld [vmem:[%s723_s1 + $0x30] sm:$0x3]  ;;  %s420_s18 = sshll.u32 %s566_s17, 4  ;;  %s421_s18 = int_to_ptr.vmem [resolvable:$true] %s420_s18 }
   0xa   :  { %v329_v19 = vld [vmem:[%s728_s6] sm:$0x7]  ;;  %v211_v61 = vld [vmem:[%s725_s3 + $0x8] sm:$0xff]  ;;  %v212_v62 = vld [vmem:[%s725_s3 + $0x10] sm:$0xf]  ;;  %s538_s19 = scalar_lea.vmem %s421_s18, 64  ;;  %p543_p1 = scmp.lt.s32.totalorder %s421_s18, %s421_s18 }
   0xb   :  { %473 = vmatmul.mubr.msk.f32.gmra.mrb[4].mxu0 %vm77_vm2, %v30_v9  ;;  %v210_v60 = vld [vmem:[%s725_s3] sm:$0xff]  ;;  %p539_p0 = scmp.ne.s32.totalorder %s421_s18, %s538_s19  ;;  %p544_p2 = scmp.lt.s32.totalorder %s538_s19, %s538_s19 }
   0xc   :  { %475 = vmatprep.mubr.msk.f32.mxu0 %vm563_vm1, %v562_v2  ;;  %64 = vperm.xlu0 %536, %v39_v10  }
   0xd   :  { %69 = vperm.xlu1 %537, %v40_v11   ;;  %p545_p3 = por %p544_p2, %p543_p1 }
   0xf   :  { %476 = vmatmul.mubr.msk.f32.gmra.mrb[6].mxu0 %vm77_vm2, %v31_v12  ;;  %p546_p4 = pnand %p545_p3, %p539_p0 }
  0x10   :  { %478 = vmatprep.mubr.msk.f32.mxu0 %vm563_vm1, %v562_v2  ;;  %74 = vperm.xlu0 %536, %v41_v13  }
  0x11   :  { %218 = vperm.xlu1 %537, %v213_v14  }
  0x13   :  { %479 = vmatmul.mubr.msk.f32.gmra.mrb[8].mxu0 %vm77_vm2, %v32_v15 }
  0x14   :  { %481 = vmatprep.mubr.msk.f32.mxu0 %vm563_vm1, %v562_v2  ;;  %223 = vperm.xlu0 %536, %v214_v16   ;;  %v328_v16 = vld [vmem:[%s727_s5] sm:$0x7] }
  0x15   :  { %228 = vperm.xlu1 %537, %v215_v17  }
  0x17   :  { %482 = vmatmul.mubr.msk.f32.gmra.mrb[10].mxu0 %vm77_vm2, %v33_v18 }
  0x18   :  { %484 = vmatprep.mubr.msk.f32.mxu0 %vm563_vm1, %v562_v2  ;;  %332 = vperm.xlu0 %536, %v329_v19  }
  0x1b   :  { %485 = vmatmul.mubr.msk.f32.gmra.mrb[12].mxu0 %vm77_vm2, %v34_v20 }
  0x83   :  { %v45_v22 = vpop.permute.xlu0 %44 }
  0x84   :  { %v55_v30 = vpop.permute.xlu1 %54 }
  0x87   :  { %v50_v26 = vpop.permute.xlu0 %49 }
  0x88   :  { %v60_v37 = vpop.permute.xlu1 %59 }
  0x8b   :  { %v65_v46 = vpop.permute.xlu0 %64 }
  0x8c   :  { %v70_v48 = vpop.permute.xlu1 %69 }
  0x8f   :  { %v75_v54 = vpop.permute.xlu0 %74 }
  0x90   :  { %v219_v1 = vpop.permute.xlu1 %218 }
  0x93   :  { %v224_v4 = vpop.permute.xlu0 %223 }
  0x94   :  { %v229_v10 = vpop.permute.xlu1 %228 }
  0x97   :  { %v333_v17 = vpop.permute.xlu0 %332 }
  0xd6   :  { %v169_v23 = vpop.f32.mrb[0].mxu0 }
  0xd7   :  { %v468_v24 = vpop.f32.mrb[1].mxu0  ;;  %v170_v25 = vadd.f32 %v169_v23, %v45_v22 }
  0xd9   :  { %v203_v31 = vmax.f32 %v170_v25, 0.0 }
  0xda   :  { %v174_v27 = vpop.f32.mrb[2].mxu0 }
  0xdb   :  { %v175_v28 = vadd.f32 %v174_v27, %v50_v26  ;;  %v471_v29 = vpop.f32.mrb[3].mxu0 }
  0xdd   :  { %v204_v32 = vmax.f32 %v175_v28, 0.0 }
  0xde   :  { %v179_v33 = vpop.f32.mrb[4].mxu0 }
  0xdf   :  { %v474_v34 = vpop.f32.mrb[5].mxu0  ;;  %v520_v35 = vpack.c.bf16 %v204_v32, %v203_v31  ;;  %v180_v36 = vadd.f32 %v179_v33, %v55_v30 }
  0xe1   :  { %521 = vmatpush3.bf16.msra.mxu1 %v520_v35  ;;  %v205_v41 = vmax.f32 %v180_v36, 0.0 }
  0xe2   :  { %v184_v38 = vpop.f32.mrb[6].mxu0  ;;  %522 = vmatprep.subr.bf16.mxu1 %v565_v21 }
  0xe3   :  { %v185_v39 = vadd.f32 %v184_v38, %v60_v37  ;;  %v477_v40 = vpop.f32.mrb[7].mxu0 }
  0xe5   :  { %v206_v42 = vmax.f32 %v185_v39, 0.0 }
  0xe6   :  { %v189_v43 = vpop.f32.mrb[8].mxu0 }
  0xe7   :  { %v523_v44 = vpack.c.bf16 %v206_v42, %v205_v41  ;;  %v480_v45 = vpop.f32.mrb[9].mxu0  ;;  %v190_v47 = vadd.f32 %v189_v43, %v65_v46 }
  0xe9   :  { %524 = vmatpush3.bf16.msra.mxu1 %v523_v44  ;;  %v207_v52 = vmax.f32 %v190_v47, 0.0 }
  0xea   :  { %v194_v49 = vpop.f32.mrb[10].mxu0  ;;  %525 = vmatprep.subr.bf16.mxu1 %v565_v21 }
  0xeb   :  { %v195_v50 = vadd.f32 %v194_v49, %v70_v48  ;;  %v483_v51 = vpop.f32.mrb[11].mxu0 }
  0xed   :  { %v208_v53 = vmax.f32 %v195_v50, 0.0 }
  0xee   :  { %v199_v55 = vpop.f32.mrb[12].mxu0 }
  0xef   :  { %v526_v56 = vpack.c.bf16 %v208_v53, %v207_v52  ;;  %v200_v57 = vadd.f32 %v199_v55, %v75_v54  ;;  %v486_v58 = vpop.f32.mrb[13].mxu0 }
  0xf1   :  { %527 = vmatpush3.bf16.msra.mxu1 %v526_v56  ;;  %v209_v59 = vmax.f32 %v200_v57, 0.0 }
  0xf2   :  { %499 = vmatprep.subr.mxu1 %v562_v2 }
  0xf5   :  { %500 = vmatpush3.msk.msra.mxu1 %vm241_vm3, %v209_v59 }
  0xf6   :  { %502 = vmatmul.mubr.msk.f32.vlgmr.msra.gmra.mrb[0].mxu1 %vm231_vm4, %v210_v60  ;;  %528 = vmatprep.subr.bf16.mxu1 %v565_v21 }
  0xf7   :  { %504 = vmatprep.mubr.msk.f32.mxu1 %vm563_vm1, %v562_v2 }
  0xfa   :  { %505 = vmatmul.mubr.msk.f32.gmra.mrb[2].mxu1 %vm231_vm4, %v211_v61 }
  0xfb   :  { %507 = vmatprep.mubr.msk.f32.mxu1 %vm563_vm1, %v562_v2 }
  0xfe   :  { %508 = vmatmul.mubr.msk.f32.gmra.mrb[4].mxu1 %vm231_vm4, %v212_v62 }
  0xff   :  { %516 = vmatprep.mubr.msk.f32.mxu1 %vm563_vm1, %v562_v2 }
 0x1c9   :  { %v311_v63 = vpop.f32.mrb[0].mxu1 }
 0x1ca   :  { %v503_v0 = vpop.f32.mrb[1].mxu1  ;;  %v312_v3 = vadd.f32 %v311_v63, %v219_v1 }
 0x1cc   :  { %v325_v8 = vmax.f32 %v312_v3, 0.0 }
 0x1cd   :  { %v316_v5 = vpop.f32.mrb[2].mxu1 }
 0x1ce   :  { %v317_v6 = vadd.f32 %v316_v5, %v224_v4  ;;  %v506_v7 = vpop.f32.mrb[3].mxu1 }
 0x1d0   :  { %v326_v9 = vmax.f32 %v317_v6, 0.0 }
 0x1d1   :  { %v321_v11 = vpop.f32.mrb[4].mxu1 }
 0x1d2   :  { %v529_v12 = vpack.c.bf16 %v326_v9, %v325_v8  ;;  %v322_v13 = vadd.f32 %v321_v11, %v229_v10  ;;  %v509_v14 = vpop.f32.mrb[5].mxu1 }
 0x1d4   :  { %530 = vmatpush3.bf16.msra.mxu1 %v529_v12  ;;  %v327_v15 = vmax.f32 %v322_v13, 0.0 }
 0x1d5   :  { %514 = vmatprep.subr.mxu1 %v562_v2 }
 0x1d8   :  { %515 = vmatpush3.msk.msra.mxu1 %vm99_vm0, %v327_v15 }
 0x1d9   :  { %517 = vmatmul.mubr.msk.f32.vlgmr.msra.gmra.mrb[6].mxu1 %vm335_vm5, %v328_v16 }
 0x2ac   :  { %v408_v18 = vpop.f32.mrb[6].mxu1 }
 0x2ad   :  { %v409_v19 = vadd.f32 %v408_v18, %v333_v17  ;;  %v518_v20 = vpop.f32.mrb[7].mxu1 }
 0x2af   :  { %413 = vst.msk [vmem:[#allocation2] sm:$0x7] %vm412_vm6, %v409_v19 }
 0x2b0   :  { %549 = shalt.err (!%p546_p4)
}
 0x2b1   :  { %s550_s21 = scalar_lea.hbm %s729_s7, 64 }
 0x2b2   :  { %p551_p5 = scmp.ne.s32.totalorder %s729_s7, %s550_s21  ;;  %p554_p6 = scmp.lt.u32.totalorder %s550_s21, %s729_s7 }
 0x2b4   :  { %p556_p7 = pnand %p554_p6, %p551_p5 }
 0x2b6   :  { %559 = shalt.err (!%p556_p7)
}
 0x2b7   :  { %423 = dma.vmem_to_hbm [thread:$0]  %s421_s18, 64, %s729_s7, [#allocation3]  }
 0x2b8   :  { %560 = dma.done.wait [#allocation3], 64  }
 0x2b9   :  { %561 = vsyncadd [#allocation3], 4294967232 }
 0x2ba   :  { %427 = vsyncpa [#allocation3], 1 }

</bundles_post_ra>
